<compile_context>
chip_gen: v6e
topology: v6e:2x2x1
jax: 0.10.0
libtpu: 0.0.40
codegen_flags: <defaults>
</compile_context>

<pallas_src>
import jax
import jax.numpy as jnp
from jax.experimental import pallas as pl
from jax.experimental.pallas import tpu as pltpu


def _min_max_scale_kernel(x_ref, stats_ref, o_ref):
    # stats_ref is (2, F_pad): row 0 = vmin, row 1 = 1/vdelta (exact f32
    # reciprocal precomputed in the wrapper). Rows broadcast over the
    # sublane (batch) axis of the (block_b, F_pad) tile.
    vmin = stats_ref[0:1, :]
    inv_delta = stats_ref[1:2, :]
    x = x_ref[...].astype(jnp.float32)
    o_ref[...] = ((x - vmin) * inv_delta).astype(o_ref.dtype)


def min_max_scale(x, vmin, vdelta, *, block_b=1024):
    """MinMaxScale.forward: (x - vmin) / vdelta with (F,) or scalar stats."""
    B, F = x.shape
    out_dtype = x.dtype

    # ---- constants: broadcast to (F,), exact f32 reciprocal computed once ----
    vmin_f = jnp.broadcast_to(jnp.asarray(vmin, jnp.float32).reshape(-1), (F,))
    vdelta_f = jnp.broadcast_to(jnp.asarray(vdelta, jnp.float32).reshape(-1), (F,))
    inv_delta = 1.0 / vdelta_f  # tiny (F,) op in the wrapper; full precision

    # ---- lane-dense last dim: pad F up to a multiple of 128 ----
    F_pad = max(128, ((F + 127) // 128) * 128)
    if F_pad != F:
        pad = F_pad - F
        x_in = jnp.pad(x, ((0, 0), (0, pad)))
        vmin_f = jnp.pad(vmin_f, (0, pad))
        inv_delta = jnp.pad(inv_delta, (0, pad), constant_values=1.0)  # finite pad lanes
    else:
        x_in = x
    stats = jnp.stack([vmin_f, inv_delta], axis=0)  # (2, F_pad): one constant operand

    # ---- tile sizing (purely HBM-bandwidth bound; big tiles amortize the
    # ~0.35 us per-grid-step overhead). Cap the tile at ~0.5M f32 elements so
    # x + out, each double-buffered, fit comfortably in v7x's 64 MiB VMEM. ----
    max_tile_elems = 512 * 1024
    bb = min(block_b, max(8, max_tile_elems // F_pad))
    bb = max(8, (bb // 8) * 8)            # multiple of 8 sublanes (f32)
    bb = min(bb, pl.cdiv(B, 8) * 8)       # small problems -> a single grid step
    grid_b = pl.cdiv(B, bb)

    tile_bytes = bb * F_pad * 4
    # x + out double-buffered, plus stats and headroom; stay <= 32 MiB scoped.
    vmem_limit = min(32 * 1024 * 1024,
                     max(16 * 1024 * 1024, 2 * 2 * tile_bytes + (4 << 20)))

    out = pl.pallas_call(
        _min_max_scale_kernel,
        out_shape=jax.ShapeDtypeStruct((B, F_pad), out_dtype),
        grid_spec=pltpu.PrefetchScalarGridSpec(
            num_scalar_prefetch=0,
            grid=(grid_b,),
            in_specs=[
                pl.BlockSpec((bb, F_pad), lambda i: (i, 0)),
                pl.BlockSpec((2, F_pad), lambda i: (0, 0)),
            ],
            out_specs=pl.BlockSpec((bb, F_pad), lambda i: (i, 0)),
        ),
        compiler_params=pltpu.CompilerParams(
            dimension_semantics=("parallel",),
            vmem_limit_bytes=vmem_limit,
        ),
    )(x_in, stats)

    if F_pad != F:
        out = out[:, :F]
    return out


if __name__ == "__main__":
    key = jax.random.PRNGKey(0)
    kx, ky = jax.random.split(key)

    # Stacked configuration: per-feature vmin / vdelta, feature axis last.
    B, F = 16, 128
    x = jax.random.normal(kx, (B, F), dtype=jnp.float32) * 3.0 + 1.5
    vmin = -2.0 + 0.05 * jnp.arange(F, dtype=jnp.float32)
    vdelta = 1.0 + 0.01 * jnp.arange(F, dtype=jnp.float32)  # vmax - vmin, nonzero

    out = jax.block_until_ready(min_max_scale(x, vmin, vdelta))
    ref = (x - vmin[None, :]) / vdelta[None, :]
    assert out.shape == ref.shape and out.dtype == ref.dtype
    assert jnp.allclose(out, ref, rtol=1e-6, atol=1e-6), "mismatch vs reference"

    # Non-128-multiple feature count exercises the lane-padding path.
    B2, F2 = 10, 5
    x2 = jax.random.normal(ky, (B2, F2), dtype=jnp.float32) * 2.0
    vmin2 = jnp.array([-1.0, 0.0, 0.5, -2.0, 3.0], dtype=jnp.float32)
    vdelta2 = jnp.array([2.0, 1.5, 0.25, 4.0, 1.0], dtype=jnp.float32)
    out2 = jax.block_until_ready(min_max_scale(x2, vmin2, vdelta2))
    ref2 = (x2 - vmin2[None, :]) / vdelta2[None, :]
    assert jnp.allclose(out2, ref2, rtol=1e-6, atol=1e-6), "mismatch (padded path)"

    print("KERNEL_OK")
</pallas_src>

<mosaic_0001>
module attributes {stable_mosaic.version = 11 : i64} {
  func.func @_min_max_scale_kernel(%arg0: i32, %arg1: memref<16x128xf32, #tpu.memory_space<vmem>>, %arg2: memref<2x128xf32, #tpu.memory_space<vmem>>, %arg3: memref<16x128xf32, #tpu.memory_space<vmem>>) attributes {dimension_semantics = [#tpu.dimension_semantics<parallel>], iteration_bounds = array<i64: 1>, scalar_prefetch = 0 : i64, scratch_operands = 0 : i64, tpu.core_type = #tpu.core_type<tc>, window_params = [{transform_indices = @transform_0, window_bounds = array<i64: 16, 128>}, {pipeline_mode = #tpu.pipeline_mode<synchronous>, transform_indices = @transform_1, window_bounds = array<i64: 2, 128>}, {transform_indices = @transform_2, window_bounds = array<i64: 16, 128>}]} {
    %c0 = arith.constant 0 : index
    %c0_0 = arith.constant 0 : index
    %0 = vector.load %arg2[%c0, %c0_0] : memref<2x128xf32, #tpu.memory_space<vmem>>, vector<1x128xf32>
    %c1 = arith.constant 1 : index
    %c0_1 = arith.constant 0 : index
    %1 = vector.load %arg2[%c1, %c0_1] : memref<2x128xf32, #tpu.memory_space<vmem>>, vector<1x128xf32>
    %c0_2 = arith.constant 0 : index
    %c0_3 = arith.constant 0 : index
    %2 = vector.load %arg1[%c0_2, %c0_3] : memref<16x128xf32, #tpu.memory_space<vmem>>, vector<16x128xf32>
    %3 = vector.broadcast %0 : vector<1x128xf32> to vector<16x128xf32>
    %4 = arith.subf %2, %3 : vector<16x128xf32>
    %5 = vector.broadcast %1 : vector<1x128xf32> to vector<16x128xf32>
    %6 = arith.mulf %4, %5 : vector<16x128xf32>
    %c0_4 = arith.constant 0 : index
    %c0_5 = arith.constant 0 : index
    %7 = vector.load %arg3[%c0_4, %c0_5] : memref<16x128xf32, #tpu.memory_space<vmem>>, vector<16x128xf32>
    tpu.vector_store %arg3[%c0_4, %c0_5], %6 {strides = array<i32>} : memref<16x128xf32, #tpu.memory_space<vmem>>, vector<16x128xf32>,
    return
  }
  func.func @transform_0(%arg0: i32) -> (i32, i32) {
    %c0_i32 = arith.constant 0 : i32
    %c0_i32_0 = arith.constant 0 : i32
    return %arg0, %c0_i32 : i32, i32
  }
  func.func @transform_1(%arg0: i32) -> (i32, i32) {
    %c0_i32 = arith.constant 0 : i32
    %c0_i32_0 = arith.constant 0 : i32
    %c0_i32_1 = arith.constant 0 : i32
    return %c0_i32, %c0_i32_0 : i32, i32
  }
  func.func @transform_2(%arg0: i32) -> (i32, i32) {
    %c0_i32 = arith.constant 0 : i32
    %c0_i32_0 = arith.constant 0 : i32
    return %arg0, %c0_i32 : i32, i32
  }
}

</mosaic_0001>

<bundles_post_ra>
// kernel: tpu_custom_call.1
= control target key start
LH: loop header
LB: loop body
LE: loop exit
PB: predicated region body
PF: predicated region fallthrough
CT: control target
= control target key end

     0   :  { %7 = vsyncpa [#allocation3], 0  ;;  %s182_s0 = inlined_call_operand.hbm [shape: f32[16,128], index: 0, kind: input, shape index: {}]   ;;  %s183_s1 = inlined_call_operand.hbm [shape: f32[2,128], index: 1, kind: input, shape index: {}]   ;;  %s184_s2 = inlined_call_operand.hbm [shape: f32[16,128], index: 2, kind: output, shape index: {}]  }
   0x1   :  { %8 = vsyncpa [#allocation6], 0 }
   0x2   :  { %9 = vsyncpa [#allocation4], 0  ;;  %s147_s9 = smov [#allocation2]  }
   0x3   :  { %s15_s10 = sshll.u32 %s147_s9, 4  ;;  %s16_s10 = int_to_ptr.vmem [resolvable:$true] %s15_s10 }
   0x4   :  { %s89_s11 = scalar_lea.vmem %s16_s10, 256  ;;  %p94_p1 = scmp.lt.s32.totalorder %s16_s10, %s16_s10 }
   0x5   :  { %p90_p0 = scmp.ne.s32.totalorder %s16_s10, %s89_s11  ;;  %p95_p2 = scmp.lt.s32.totalorder %s89_s11, %s89_s11 }
   0x7   :  { %p96_p3 = por %p95_p2, %p94_p1 }
   0x9   :  { %p97_p4 = pnand %p96_p3, %p90_p0 }
   0xb   :  { %100 = shalt.err (!%p97_p4)
}
   0xc   :  { %s148_s12 = smov 128   ;;  %s149_s13 = smov 8  }
   0xd   :  { %21 = dma.hbm_to_vmem [thread:$0]  %s182_s0, 256, %s16_s10, [#allocation3], %s148_s12, %s148_s12, %s149_s13  }
   0xe   :  { %s150_s16 = smov [#allocation5]  }
   0xf   :  { %s28_s17 = sshll.u32 %s150_s16, 4  ;;  %s29_s17 = int_to_ptr.vmem [resolvable:$true] %s28_s17 }
  0x10   :  { %s109_s18 = scalar_lea.vmem %s29_s17, 32  ;;  %p114_p6 = scmp.lt.s32.totalorder %s29_s17, %s29_s17 }
  0x11   :  { %p110_p5 = scmp.ne.s32.totalorder %s29_s17, %s109_s18  ;;  %p115_p7 = scmp.lt.s32.totalorder %s109_s18, %s109_s18 }
  0x13   :  { %p116_p8 = por %p115_p7, %p114_p6 }
  0x15   :  { %p117_p9 = pnand %p116_p8, %p110_p5 }
  0x17   :  { %120 = shalt.err (!%p117_p9)
}
  0x18   :  { %31 = dma.hbm_to_vmem [thread:$0]  %s183_s1, 32, %s29_s17, [#allocation6]  }
  0x19   :  { %141 = dma.done.wait [#allocation3], 256  }
  0x1a   :  { %142 = vsyncadd [#allocation3], 4294967040 }
  0x1b   :  { %143 = dma.done.wait [#allocation6], 32  }
  0x1c   :  { %144 = vsyncadd [#allocation6], 4294967264  ;;  %v74_v0 = vld [vmem:[#allocation5] ss:$0 sm:$0xff]  ;;  %v75_v1 = vld [vmem:[#allocation5 + $0x1] ss:$0 sm:$0xff] }
  0x1d   :  { %v40_v2 = vld [vmem:[#allocation2] sm:$0xff]  ;;  %v41_v4 = vld [vmem:[#allocation2 + $0x8] sm:$0xff]  ;;  %s151_s0 = smov [#allocation7]  }
  0x1e   :  { %v46_v3 = vsub.f32 %v40_v2, %v74_v0  ;;  %s61_s21 = sshll.u32 %s151_s0, 4  ;;  %v47_v5 = vsub.f32 %v41_v4, %v74_v0  ;;  %s62_s21 = int_to_ptr.vmem [resolvable:$true] %s61_s21 }
  0x1f   :  { %s121_s22 = scalar_lea.vmem %s62_s21, 256  ;;  %p126_p11 = scmp.lt.s32.totalorder %s62_s21, %s62_s21 }
  0x20   :  { %v52_v6 = vmul.f32 %v75_v1, %v46_v3  ;;  %v53_v7 = vmul.f32 %v75_v1, %v47_v5  ;;  %p122_p10 = scmp.ne.s32.totalorder %s62_s21, %s121_s22  ;;  %p127_p12 = scmp.lt.s32.totalorder %s121_s22, %s121_s22 }
  0x22   :  { %54 = vst [vmem:[#allocation7] sm:$0xff] %v52_v6  ;;  %55 = vst [vmem:[#allocation7 + $0x8] sm:$0xff] %v53_v7  ;;  %p128_p13 = por %p127_p12, %p126_p11 }
  0x24   :  { %p129_p0 = pnand %p128_p13, %p122_p10 }
  0x26   :  { %132 = shalt.err (!%p129_p0)
}
  0x27   :  { %67 = dma.vmem_to_hbm [thread:$0]  %s62_s21, 256, %s184_s2, [#allocation4], %s148_s12, %s148_s12, %s149_s13  }
  0x28   :  { %145 = dma.done.wait [#allocation4], 256  }
  0x29   :  { %146 = vsyncadd [#allocation4], 4294967040 }
  0x2a   :  { %71 = vsyncpa [#allocation3], 1 }
  0x2b   :  { %72 = vsyncpa [#allocation6], 1 }
  0x2c   :  { %73 = vsyncpa [#allocation4], 1 }

</bundles_post_ra>
